<compile_context>
chip_gen: v7x
topology: tpu7x:2x2x1
jax: 0.10.0
libtpu: 0.0.40
codegen_flags: <defaults>
</compile_context>

<pallas_src>
import functools
import math

import jax
import jax.numpy as jnp
from jax.experimental import pallas as pl
from jax.experimental.pallas import tpu as pltpu


# ----------------------------- kernel bodies ------------------------------- #

def _rmsnorm_kernel(x_ref, w_ref, o_ref, *, eps: float, inv_d: float,
                    lp_scale: bool):
    # x_ref: (tile_rows, d_pad), w_ref: (1, d_pad) broadcasting over rows.
    x = x_ref[...]
    xf = x.astype(jnp.float32)
    # f32 accumulation of the sum of squares; normalize by the TRUE d_model
    # (padded columns are zero, so they do not contribute).
    ss = jnp.sum(xf * xf, axis=-1, keepdims=True) * inv_d   # (tile_rows, 1)
    inv = jax.lax.rsqrt(ss + eps)                            # EUP rsqrt, f32
    if lp_scale:
        # bf16 scaling path (v6e/v7x): halves VALU ops / f32 intermediates.
        y = (x * inv.astype(x.dtype)) * w_ref[...].astype(x.dtype)
    else:
        y = xf * inv * w_ref[...].astype(jnp.float32)
    o_ref[...] = y.astype(o_ref.dtype)


def _rmsnorm_kernel_mup(x_ref, o_ref, *, eps: float, inv_d: float,
                        lp_scale: bool):
    # use_mup=True path: no weight parameter.
    x = x_ref[...]
    xf = x.astype(jnp.float32)
    ss = jnp.sum(xf * xf, axis=-1, keepdims=True) * inv_d
    inv = jax.lax.rsqrt(ss + eps)
    if lp_scale:
        y = x * inv.astype(x.dtype)
    else:
        y = xf * inv
    o_ref[...] = y.astype(o_ref.dtype)


# --------------------------- tiling policy --------------------------------- #

@functools.lru_cache(maxsize=1)
def _tpu_generation_info():
    """(vmem_capacity_bytes, num_tensorcores_per_chip, supports_bf16_valu)."""
    vmem_cap = 64 * 1024 * 1024           # conservative fallback (v7x-sized)
    num_cores = 1
    supports_bf16_valu = True
    try:
        info = pltpu.get_tpu_info()
        vmem_cap = int(getattr(info, "vmem_capacity_bytes", vmem_cap))
    except Exception:
        pass
    try:
        kind = jax.devices()[0].device_kind.lower()
    except Exception:
        kind = ""
    # v5e ("v5 lite") has no bf16 VALU/EUP -> keep the pure-f32 scaling body.
    if "v5" in kind and ("lite" in kind or "v5e" in kind):
        supports_bf16_valu = False
    # v7x has 2 TensorCores per chip sharing HBM.
    if "7" in kind:
        num_cores = 2
    return vmem_cap, num_cores, supports_bf16_valu


def _choose_tile_rows(rows: int, d_pad: int, in_itemsize: int, out_itemsize: int,
                      *, vmem_budget_bytes: int, num_cores: int,
                      lp_scale: bool) -> int:
    """Largest sublane-aligned row tile within the VMEM budget.

    Budget accounts for double-buffered input + output tiles plus the f32
    intermediates materialized inside the kernel (halved on the bf16 path).
    """
    inter_bytes = 6 if lp_scale else 12
    per_row = d_pad * (2 * in_itemsize + 2 * out_itemsize + inter_bytes)
    t = max(8, vmem_budget_bytes // max(per_row, 1))

    # Byte-based block cap: keep each input DMA block around the ~2-8 MiB
    # sweet spot regardless of d_model width.
    max_block_bytes = 8 * 1024 * 1024
    t = min(t, max(8, max_block_bytes // max(d_pad * in_itemsize, 1)))

    padded_groups = -(-rows // 8)                  # rows in 8-row sublane groups
    t = min(t, padded_groups * 8)                  # never larger than the input
    t = max(8, (t // 8) * 8)                       # sublane-aligned

    if num_cores >= 2:
        # v7x: the grid axis is sharded across 2 TCs — prefer an even grid of
        # at least 2 steps so neither core idles for a full large-tile step.
        tg = t // 8
        while tg > 1 and (-(-padded_groups // tg)) % 2 == 1:
            tg -= 1
        t = tg * 8
    # Single-TC parts (v5e/v6e): no forced split — the grid is a serial loop,
    # so fewer, bigger steps amortize the ~0.35 us per-step overhead.
    return int(t)


# ------------------------------ wrapper ------------------------------------ #

def rmsnorm(x, weight=None, *, eps: float = 1e-5, use_mup: bool = False,
            tile_rows: int | None = None):
    """RMSNorm over the last axis of x.

    x: (..., d_model). weight: (d_model,) when use_mup is False.
    Matches: x * rsqrt(mean(x^2, -1, keepdim=True) + eps) [* weight].
    """
    orig_shape = x.shape
    d_model = orig_shape[-1]
    rows = math.prod(orig_shape[:-1]) if len(orig_shape) > 1 else 1
    x2 = x.reshape(rows, d_model)

    vmem_cap, num_cores, supports_bf16 = _tpu_generation_info()
    vmem_limit = vmem_cap // 2                     # 64 MiB on v5e/v6e, 32 on v7x
    vmem_budget = (vmem_cap * 3) // 8              # 48 MiB on v5e/v6e, 24 on v7x

    lp_scale = bool(supports_bf16 and x.dtype == jnp.bfloat16)

    # Lane-dense output: pad d_model to a multiple of 128 once in HBM so stores
    # are unmasked; the kernel normalizes by the true d_model so padded zeros
    # do not change the result. Production d_model % 128 == 0 skips this.
    d_pad = d_model if d_model % 128 == 0 else ((d_model + 127) // 128) * 128
    pad_cols = d_pad - d_model
    if pad_cols:
        x2 = jnp.pad(x2, ((0, 0), (0, pad_cols)))

    in_itemsize = jnp.dtype(x.dtype).itemsize
    if tile_rows is None:
        tile_rows = _choose_tile_rows(
            rows, d_pad, in_itemsize, in_itemsize,
            vmem_budget_bytes=vmem_budget, num_cores=num_cores,
            lp_scale=lp_scale)

    grid = (pl.cdiv(rows, tile_rows),)             # partial last block is clipped

    compiler_params = pltpu.CompilerParams(
        dimension_semantics=("parallel",),
        vmem_limit_bytes=int(vmem_limit),
    )
    cost_estimate = pl.CostEstimate(
        flops=4 * rows * d_pad,
        transcendentals=rows,
        bytes_accessed=2 * rows * d_pad * in_itemsize + d_pad * in_itemsize,
    )

    row_spec = pl.BlockSpec((tile_rows, d_pad), lambda i: (i, 0))
    inv_d = 1.0 / float(d_model)

    if use_mup:
        out = pl.pallas_call(
            functools.partial(_rmsnorm_kernel_mup, eps=eps, inv_d=inv_d,
                              lp_scale=lp_scale),
            out_shape=jax.ShapeDtypeStruct((rows, d_pad), x.dtype),
            grid=grid,
            in_specs=[row_spec],
            out_specs=row_spec,
            compiler_params=compiler_params,
            cost_estimate=cost_estimate,
        )(x2)
    else:
        assert weight is not None and weight.shape == (d_model,)
        w2 = weight.reshape(1, d_model)
        if pad_cols:
            w2 = jnp.pad(w2, ((0, 0), (0, pad_cols)))
        out = pl.pallas_call(
            functools.partial(_rmsnorm_kernel, eps=eps, inv_d=inv_d,
                              lp_scale=lp_scale),
            out_shape=jax.ShapeDtypeStruct((rows, d_pad), x.dtype),
            grid=grid,
            in_specs=[
                row_spec,
                # constant index_map -> weight stays VMEM-resident (single DMA)
                pl.BlockSpec((1, d_pad), lambda i: (0, 0)),
            ],
            out_specs=row_spec,
            compiler_params=compiler_params,
            cost_estimate=cost_estimate,
        )(x2, w2)

    if pad_cols:
        out = out[:, :d_model]
    return out.reshape(orig_shape)


def rmsnorm_reference(x, weight=None, *, eps: float = 1e-5, use_mup: bool = False):
    xf = x.astype(jnp.float32)
    out = xf * jax.lax.rsqrt(jnp.mean(xf * xf, axis=-1, keepdims=True) + eps)
    if not use_mup:
        out = out * weight.astype(jnp.float32)
    return out.astype(x.dtype)


if __name__ == "__main__":
    key = jax.random.PRNGKey(0)
    batch, seq, d_model = 2, 8, 32

    x = jax.random.normal(key, (batch, seq, d_model), dtype=jnp.float32)
    # PyTorch initializes the RMSNorm weight to ones.
    weight = jnp.ones((d_model,), dtype=jnp.float32)

    y = rmsnorm(x, weight, eps=1e-5, use_mup=False)
    jax.block_until_ready(y)
    y_ref = rmsnorm_reference(x, weight, eps=1e-5, use_mup=False)
    assert y.shape == x.shape and y.dtype == x.dtype
    assert jnp.allclose(y, y_ref, atol=1e-5, rtol=1e-5)

    # use_mup=True (no-weight) path
    y_mup = rmsnorm(x, eps=1e-5, use_mup=True)
    jax.block_until_ready(y_mup)
    y_mup_ref = rmsnorm_reference(x, eps=1e-5, use_mup=True)
    assert jnp.allclose(y_mup, y_mup_ref, atol=1e-5, rtol=1e-5)

    # ragged row count (rows % tile_rows != 0): exercises the clipped last block
    x_r = jax.random.normal(jax.random.PRNGKey(1), (3, 5, d_model), dtype=jnp.float32)
    y_r = rmsnorm(x_r, weight, eps=1e-5, use_mup=False)
    jax.block_until_ready(y_r)
    y_r_ref = rmsnorm_reference(x_r, weight, eps=1e-5, use_mup=False)
    assert jnp.allclose(y_r, y_r_ref, atol=1e-5, rtol=1e-5)

    # bf16 input with lane-dense d_model: exercises the low-precision scaling
    # path (on v6e/v7x) while keeping f32 sum-of-squares/rsqrt.
    d_bf = 256
    x_bf = jax.random.normal(jax.random.PRNGKey(2), (4, 16, d_bf),
                             dtype=jnp.float32).astype(jnp.bfloat16)
    w_bf = jnp.ones((d_bf,), dtype=jnp.bfloat16)
    y_bf = rmsnorm(x_bf, w_bf, eps=1e-5, use_mup=False)
    jax.block_until_ready(y_bf)
    y_bf_ref = rmsnorm_reference(x_bf, w_bf, eps=1e-5, use_mup=False)
    assert y_bf.dtype == jnp.bfloat16
    assert jnp.allclose(y_bf.astype(jnp.float32), y_bf_ref.astype(jnp.float32),
                        atol=3e-2, rtol=3e-2)

    print("KERNEL_OK")
</pallas_src>

<mosaic_0001>
module attributes {stable_mosaic.version = 11 : i64} {
  func.func @_rmsnorm_kernel(%arg0: i32, %arg1: memref<16x128xf32, #tpu.memory_space<vmem>>, %arg2: memref<1x128xf32, #tpu.memory_space<vmem>>, %arg3: memref<16x128xf32, #tpu.memory_space<vmem>>) attributes {dimension_semantics = [#tpu.dimension_semantics<parallel>], iteration_bounds = array<i64: 1>, scalar_prefetch = 0 : i64, scratch_operands = 0 : i64, tpu.core_type = #tpu.core_type<tc>, window_params = [{transform_indices = @transform_0, window_bounds = array<i64: 16, 128>}, {pipeline_mode = #tpu.pipeline_mode<synchronous>, transform_indices = @transform_1, window_bounds = array<i64: 1, 128>}, {transform_indices = @transform_2, window_bounds = array<i64: 16, 128>}]} {
    %c0 = arith.constant 0 : index
    %c0_0 = arith.constant 0 : index
    %0 = vector.load %arg1[%c0, %c0_0] : memref<16x128xf32, #tpu.memory_space<vmem>>, vector<16x128xf32>
    %1 = arith.mulf %0, %0 : vector<16x128xf32>
    %cst = arith.constant dense<0.000000e+00> : vector<16xf32>
    %2 = vector.multi_reduction <add>, %1, %cst [1] : vector<16x128xf32> to vector<16xf32>
    %3 = vector.shape_cast %2 : vector<16xf32> to vector<16x1xf32>
    %cst_1 = arith.constant 3.125000e-02 : f32
    %4 = vector.broadcast %cst_1 : f32 to vector<16x1xf32>
    %5 = arith.mulf %3, %4 : vector<16x1xf32>
    %cst_2 = arith.constant 9.99999974E-6 : f32
    %6 = vector.broadcast %cst_2 : f32 to vector<16x1xf32>
    %7 = arith.addf %5, %6 : vector<16x1xf32>
    %8 = math.rsqrt %7 : vector<16x1xf32>
    %9 = vector.broadcast %8 : vector<16x1xf32> to vector<16x128xf32>
    %10 = arith.mulf %0, %9 : vector<16x128xf32>
    %c0_3 = arith.constant 0 : index
    %c0_4 = arith.constant 0 : index
    %11 = vector.load %arg2[%c0_3, %c0_4] : memref<1x128xf32, #tpu.memory_space<vmem>>, vector<1x128xf32>
    %12 = vector.broadcast %11 : vector<1x128xf32> to vector<16x128xf32>
    %13 = arith.mulf %10, %12 : vector<16x128xf32>
    %c0_5 = arith.constant 0 : index
    %c0_6 = arith.constant 0 : index
    %14 = vector.load %arg3[%c0_5, %c0_6] : memref<16x128xf32, #tpu.memory_space<vmem>>, vector<16x128xf32>
    tpu.vector_store %arg3[%c0_5, %c0_6], %13 {strides = array<i32>} : memref<16x128xf32, #tpu.memory_space<vmem>>, vector<16x128xf32>,
    return
  }
  func.func @transform_0(%arg0: i32) -> (i32, i32) {
    %c0_i32 = arith.constant 0 : i32
    %c0_i32_0 = arith.constant 0 : i32
    return %arg0, %c0_i32 : i32, i32
  }
  func.func @transform_1(%arg0: i32) -> (i32, i32) {
    %c0_i32 = arith.constant 0 : i32
    %c0_i32_0 = arith.constant 0 : i32
    %c0_i32_1 = arith.constant 0 : i32
    return %c0_i32, %c0_i32_0 : i32, i32
  }
  func.func @transform_2(%arg0: i32) -> (i32, i32) {
    %c0_i32 = arith.constant 0 : i32
    %c0_i32_0 = arith.constant 0 : i32
    return %arg0, %c0_i32 : i32, i32
  }
}

</mosaic_0001>

<bundles_post_ra>
// kernel: tpu_custom_call.1
= control target key start
LH: loop header
LB: loop body
LE: loop exit
PB: predicated region body
PF: predicated region fallthrough
CT: control target
= control target key end

     0   :  { %7 = vsyncpa [#allocation3], 0  ;;  %s179_s0 = inlined_call_operand.hbm [shape: f32[16,128], index: 0, kind: input, shape index: {}]   ;;  %s180_s1 = inlined_call_operand.vmem [shape: f32[1,128], index: 1, kind: input, shape index: {}]   ;;  %s181_s2 = inlined_call_operand.hbm [shape: f32[16,128], index: 2, kind: output, shape index: {}]  }
   0x1   :  { %8 = vsyncpa [#allocation4], 0  ;;  %s127_s9 = smov [#allocation2]   ;;  %s79_s13 = scalar_lea.hbm %s179_s0, 256 }
   0x2   :  { %s14_s10 = sshll.u32 %s127_s9, 4  ;;  %p80_p0 = scmp.ne.s32.totalorder %s179_s0, %s79_s13  ;;  %s15_s10 = int_to_ptr.vmem [resolvable:$true] %s14_s10 }
   0x3   :  { %p83_p1 = scmp.lt.u32.totalorder %s79_s13, %s179_s0 }
   0x5   :  { %p85_p2 = pnand %p83_p1, %p80_p0 }
   0x7   :  { %88 = shalt.err (!%p85_p2)
}
   0x8   :  { %s89_s18 = scalar_lea.vmem %s15_s10, 256  ;;  %p94_p4 = scmp.lt.s32.totalorder %s15_s10, %s15_s10 }
   0x9   :  { %p90_p3 = scmp.ne.s32.totalorder %s15_s10, %s89_s18  ;;  %p95_p5 = scmp.lt.s32.totalorder %s89_s18, %s89_s18 }
   0xb   :  { %p96_p6 = por %p95_p5, %p94_p4 }
   0xd   :  { %p97_p7 = pnand %p96_p6, %p90_p3 }
   0xf   :  { %100 = shalt.err (!%p97_p7)
}
  0x10   :  { %s128_s19 = smov 128   ;;  %s129_s20 = smov 8  }
  0x11   :  { %20 = dma.hbm_to_vmem [thread:$0]  %s179_s0, 256, %s15_s10, [#allocation3], %s128_s19, %s128_s19, %s129_s20  }
  0x12   :  { %123 = dma.done.wait [#allocation3], 256  }
  0x13   :  { %124 = vsyncadd [#allocation3], 4294967040  ;;  %v26_v0 = vld [vmem:[#allocation2] sm:$0xff]  ;;  %v27_v1 = vld [vmem:[#allocation2 + $0x8] sm:$0xff]  ;;  %s130_s0 = smov [#allocation5]  }
  0x14   :  { %v28_v2 = vmul.f32 %v26_v0, %v26_v0  ;;  %v29_v3 = vmul.f32 %v27_v1, %v27_v1  ;;  %v70_v11 = vld [vmem:[%s180_s1] ss:$0 sm:$0xff]  ;;  %s58_s25 = sshll.u32 %s130_s0, 4  ;;  %s59_s25 = int_to_ptr.vmem [resolvable:$true] %s58_s25 }
  0x15   :  { %s101_s26 = scalar_lea.vmem %s59_s25, 256  ;;  %p106_p9 = scmp.lt.s32.totalorder %s59_s25, %s59_s25 }
  0x16   :  { %30 = vadd.xlane.f32.xlu0 %v28_v2  ;;  %p102_p8 = scmp.ne.s32.totalorder %s59_s25, %s101_s26  ;;  %p107_p10 = scmp.lt.s32.totalorder %s101_s26, %s101_s26 }
  0x18   :  { %p108_p11 = por %p107_p10, %p106_p9 }
  0x1a   :  { %32 = vadd.xlane.f32.xlu0 %v29_v3  ;;  %p109_p12 = pnand %p108_p11, %p102_p8 }
  0xa3   :  { %v31_v4 = vpop.xlane.xlu0 %30 }
  0xa4   :  { %v34_v5 = vmul.f32 0.03125, %v31_v4 }
  0xa6   :  { %v36_v6 = vadd.f32 1e-05, %v34_v5 }
  0xa7   :  { %v33_v7 = vpop.xlane.xlu0 %32 }
  0xa8   :  { %75 = vrsqrt.f32 %v36_v6  ;;  %v35_v8 = vmul.f32 0.03125, %v33_v7 }
  0xaa   :  { %v37_v9 = vadd.f32 1e-05, %v35_v8 }
  0xac   :  { %77 = vrsqrt.f32 %v37_v9 }
  0xb2   :  { %v76_v10 = vpop.eup %75 }
  0xb3   :  { %v40_v12 = vmul.f32 %v76_v10, %v26_v0 }
  0xb5   :  { %v49_v13 = vmul.f32 %v70_v11, %v40_v12 }
  0xb6   :  { %v78_v14 = vpop.eup %77 }
  0xb7   :  { %v41_v15 = vmul.f32 %v78_v14, %v27_v1  ;;  %51 = vst [vmem:[#allocation5] sm:$0xff] %v49_v13 }
  0xb9   :  { %v50_v16 = vmul.f32 %v70_v11, %v41_v15 }
  0xbb   :  { %52 = vst [vmem:[#allocation5 + $0x8] sm:$0xff] %v50_v16 }
  0xbc   :  { %112 = shalt.err (!%p109_p12)
}
  0xbd   :  { %s113_s1 = scalar_lea.hbm %s181_s2, 256 }
  0xbe   :  { %p114_p13 = scmp.ne.s32.totalorder %s181_s2, %s113_s1  ;;  %p117_p0 = scmp.lt.u32.totalorder %s113_s1, %s181_s2 }
  0xc0   :  { %p119_p1 = pnand %p117_p0, %p114_p13 }
  0xc2   :  { %122 = shalt.err (!%p119_p1)
}
  0xc3   :  { %64 = dma.vmem_to_hbm [thread:$0]  %s59_s25, 256, %s181_s2, [#allocation4], %s128_s19, %s128_s19, %s129_s20  }
  0xc4   :  { %125 = dma.done.wait [#allocation4], 256  }
  0xc5   :  { %126 = vsyncadd [#allocation4], 4294967040 }
  0xc6   :  { %68 = vsyncpa [#allocation3], 1 }
  0xc7   :  { %69 = vsyncpa [#allocation4], 1 }

</bundles_post_ra>
